<compile_context>
chip_gen: v5e
topology: v5e:2x2
jax: 0.10.0
libtpu: 0.0.40
codegen_flags: <defaults>
</compile_context>

<pallas_src>
import math

import jax
import jax.numpy as jnp
from jax.experimental import pallas as pl
from jax.experimental.pallas import tpu as pltpu


def kan_kernel(x_ref, w1_ref, b1_ref, w2_ref, b2_ref, o_ref):
    # fc1 on the lane-packed batch: (tile, P*d_in) @ (P*d_in, P*H); f32 MXU acc.
    h = jnp.dot(x_ref[...], w1_ref[...], preferred_element_type=jnp.float32)
    # Bias add + ReLU in f32 on the VPU (biases stay f32 even for bf16 I/O).
    h = jnp.maximum(h + b1_ref[...], 0.0)
    # fc2: cast activations to the weight dtype for the MXU input, accumulate f32.
    out = jnp.dot(h.astype(w2_ref.dtype), w2_ref[...],
                  preferred_element_type=jnp.float32)
    out = out + b2_ref[...]
    o_ref[...] = out.astype(o_ref.dtype)


def _round_up(n, m):
    return ((n + m - 1) // m) * m


def kan_forward(x, w1_t, b1, w2_t, b2, *, tile_b=8192, pack=None,
                io_dtype=None, vmem_budget_bytes=24 * 1024 * 1024):
    """KAN forward: relu(x @ w1_t + b1) @ w2_t + b2.

    x: (B, D_in); w1_t: (D_in, H); b1: (1, H); w2_t: (H, D_out); b2: (1, D_out).
    tile_b is in *unpacked* rows. io_dtype (e.g. jnp.bfloat16) sets the storage
    dtype of x / weights / output; accumulation and the bias+ReLU epilogue are f32.
    vmem_budget_bytes should stay <= ~40 MiB if targeting v7x (64 MiB physical VMEM).
    """
    if io_dtype is not None:
        x = x.astype(io_dtype)
        w1_t = w1_t.astype(io_dtype)
        w2_t = w2_t.astype(io_dtype)
    b1 = b1.astype(jnp.float32).reshape(1, -1)
    b2 = b2.astype(jnp.float32).reshape(1, -1)

    B, d_in = x.shape
    H = w1_t.shape[1]
    d_out = w2_t.shape[1]
    io_dt = x.dtype
    io_itemsize = jnp.dtype(io_dt).itemsize

    # ---- Lane-pack the batch: P rows become one lane-dense packed row. ----
    if pack is None:
        pack = 128 // math.gcd(128, d_out)   # smallest P making P*d_out lane-dense
        pack = max(1, min(pack, 32))         # cap block-diagonal weight blow-up
    P = int(pack)

    B_pad = _round_up(B, P)
    if B_pad != B:
        # TODO(synk): this pad copies x once; it is only needed to make the pack
        # reshape legal (at most P-1 zero rows, discarded by the final slice).
        x = jnp.pad(x, ((0, B_pad - B), (0, 0)))
    Bp = B_pad // P
    d_in_p, H_p, d_out_p = P * d_in, P * H, P * d_out

    x_p = x.reshape(Bp, d_in_p)                       # free row-major view
    eye = jnp.eye(P, dtype=w1_t.dtype)
    w1_bd = jnp.kron(eye, w1_t)                       # (P*d_in, P*H) block-diagonal
    w2_bd = jnp.kron(eye.astype(w2_t.dtype), w2_t)    # (P*H, P*d_out) block-diagonal
    b1_p = jnp.tile(b1, (1, P))                       # (1, P*H), f32
    b2_p = jnp.tile(b2, (1, P))                       # (1, P*d_out), f32

    # ---- VMEM-aware tile sizing (packed rows), lane-padded accounting. ----
    lane = lambda n: _round_up(n, 128)
    row_align = 16 if io_itemsize == 2 else 8
    # Double-buffered streamed tiles (x, out) + f32 intermediates (h, pre-cast out).
    bytes_per_row = (2 * lane(d_in_p) * io_itemsize +
                     2 * lane(d_out_p) * io_itemsize +
                     lane(H_p) * 4 + lane(d_out_p) * 4)
    # Resident params (count 2x buffers to stay conservative) in io dtype + f32 biases.
    param_bytes = 2 * ((d_in_p * lane(H_p) + H_p * lane(d_out_p)) * io_itemsize
                       + (lane(H_p) + lane(d_out_p)) * 4)
    headroom = 2 * 1024 * 1024                        # compiler scratch slack
    max_rows = max(row_align,
                   (vmem_budget_bytes - param_bytes - headroom) // max(bytes_per_row, 1))

    tile_bp = max(row_align, tile_b // P)             # requested tile, packed rows
    tile_bp = min(tile_bp, max_rows)
    tile_bp = max(row_align, (tile_bp // row_align) * row_align)

    if Bp <= row_align:
        tile_bp = Bp                                  # single full-extent block
    else:
        tile_bp = min(tile_bp, _round_up(Bp, row_align))
        # Keep >=2 grid steps when possible: pipelining + v7x megacore sharding.
        half = _round_up(pl.cdiv(Bp, 2), row_align)
        tile_bp = min(tile_bp, half)

    grid = (pl.cdiv(Bp, tile_bp),)   # ragged last block: Pallas masks OOB rows

    # >=32 MiB raises v5e's 16 MiB scoped default; cap at 48 MiB for v7x safety.
    vmem_limit_bytes = min(48 * 1024 * 1024,
                           max(32 * 1024 * 1024,
                               int(vmem_budget_bytes) + param_bytes + headroom))

    out_p = pl.pallas_call(
        kan_kernel,
        out_shape=jax.ShapeDtypeStruct((Bp, d_out_p), io_dt),
        grid_spec=pltpu.PrefetchScalarGridSpec(
            num_scalar_prefetch=0,
            grid=grid,
            in_specs=[
                pl.BlockSpec((tile_bp, d_in_p), lambda i: (i, 0)),  # x tile (streamed)
                pl.BlockSpec((d_in_p, H_p), lambda i: (0, 0)),      # W1 block-diag (resident)
                pl.BlockSpec((1, H_p), lambda i: (0, 0)),           # b1 (f32, resident)
                pl.BlockSpec((H_p, d_out_p), lambda i: (0, 0)),     # W2 block-diag (resident)
                pl.BlockSpec((1, d_out_p), lambda i: (0, 0)),       # b2 (f32, resident)
            ],
            out_specs=pl.BlockSpec((tile_bp, d_out_p), lambda i: (i, 0)),
        ),
        compiler_params=pltpu.CompilerParams(
            dimension_semantics=("parallel",),        # batch tiles shard across TCs (v7x)
            vmem_limit_bytes=vmem_limit_bytes),
    )(x_p, w1_bd, b1_p, w2_bd, b2_p)

    out = out_p.reshape(B_pad, d_out)                 # free row-major view back
    return out[:B] if B_pad != B else out


def init_kan_params(key, width):
    """Deterministic init mimicking nn.Linear's U(-1/sqrt(fan_in), 1/sqrt(fan_in))."""
    d_in, hidden, d_out = width
    k1, k2, k3, k4 = jax.random.split(key, 4)
    bound1 = 1.0 / jnp.sqrt(d_in)
    bound2 = 1.0 / jnp.sqrt(hidden)
    # Stored pre-transposed: (fan_in, fan_out).
    w1_t = jax.random.uniform(k1, (d_in, hidden), jnp.float32, -bound1, bound1)
    b1 = jax.random.uniform(k2, (1, hidden), jnp.float32, -bound1, bound1)
    w2_t = jax.random.uniform(k3, (hidden, d_out), jnp.float32, -bound2, bound2)
    b2 = jax.random.uniform(k4, (1, d_out), jnp.float32, -bound2, bound2)
    return w1_t, b1, w2_t, b2


if __name__ == "__main__":
    width = [16, 32, 8]   # KAN(width=[16, 32, 8], grid=*, k=*) — grid/k unused in forward
    batch = 250           # ragged on purpose: exercises the pack-pad + ragged-tile path

    key = jax.random.PRNGKey(0)
    kx, kp = jax.random.split(key)
    x = jax.random.normal(kx, (batch, width[0]), jnp.float32)
    w1_t, b1, w2_t, b2 = init_kan_params(kp, width)

    # Pure-JAX reference.
    ref = jnp.maximum(x @ w1_t + b1, 0.0) @ w2_t + b2

    # f32 run: lane-packed batch (16 packed rows), 2 batch tiles -> pipelined grid.
    out = kan_forward(x, w1_t, b1, w2_t, b2)
    out = jax.block_until_ready(out)
    assert out.shape == (batch, width[2])
    assert jnp.allclose(out, ref, atol=1e-4, rtol=1e-4)

    # bf16 I/O run (halves dominant HBM traffic); f32 accumulate, loose tolerance.
    out_bf16 = kan_forward(x, w1_t, b1, w2_t, b2, io_dtype=jnp.bfloat16)
    out_bf16 = jax.block_until_ready(out_bf16)
    assert out_bf16.shape == (batch, width[2])
    assert jnp.allclose(out_bf16.astype(jnp.float32), ref, atol=1e-1, rtol=5e-2)

    print("KERNEL_OK")
</pallas_src>

<mosaic_0001>
module attributes {stable_mosaic.version = 11 : i64} {
  func.func @kan_kernel(%arg0: i32, %arg1: memref<8x256xf32, #tpu.memory_space<vmem>>, %arg2: memref<256x512xf32, #tpu.memory_space<vmem>>, %arg3: memref<1x512xf32, #tpu.memory_space<vmem>>, %arg4: memref<512x128xf32, #tpu.memory_space<vmem>>, %arg5: memref<1x128xf32, #tpu.memory_space<vmem>>, %arg6: memref<8x128xf32, #tpu.memory_space<vmem>>) attributes {dimension_semantics = [#tpu.dimension_semantics<parallel>], iteration_bounds = array<i64: 2>, scalar_prefetch = 0 : i64, scratch_operands = 0 : i64, tpu.core_type = #tpu.core_type<tc>, window_params = [{transform_indices = @transform_0, window_bounds = array<i64: 8, 256>}, {pipeline_mode = #tpu.pipeline_mode<synchronous>, transform_indices = @transform_1, window_bounds = array<i64: 256, 512>}, {pipeline_mode = #tpu.pipeline_mode<synchronous>, transform_indices = @transform_2, window_bounds = array<i64: 1, 512>}, {pipeline_mode = #tpu.pipeline_mode<synchronous>, transform_indices = @transform_3, window_bounds = array<i64: 512, 128>}, {pipeline_mode = #tpu.pipeline_mode<synchronous>, transform_indices = @transform_4, window_bounds = array<i64: 1, 128>}, {transform_indices = @transform_5, window_bounds = array<i64: 8, 128>}]} {
    %c0 = arith.constant 0 : index
    %c0_0 = arith.constant 0 : index
    %0 = vector.load %arg1[%c0, %c0_0] : memref<8x256xf32, #tpu.memory_space<vmem>>, vector<8x256xf32>
    %c0_1 = arith.constant 0 : index
    %c0_2 = arith.constant 0 : index
    %1 = vector.load %arg2[%c0_1, %c0_2] : memref<256x512xf32, #tpu.memory_space<vmem>>, vector<256x512xf32>
    %cst = arith.constant dense<0.000000e+00> : vector<8x512xf32>
    %2 = tpu.matmul %0, %1, %cst {dimension_numbers = #tpu.dot_dimension_numbers<[1], [0], [0], [1], [0, 0, 1, 1], [], []>} : vector<8x256xf32>, vector<256x512xf32>, vector<8x512xf32> -> vector<8x512xf32>
    %c0_3 = arith.constant 0 : index
    %c0_4 = arith.constant 0 : index
    %3 = vector.load %arg3[%c0_3, %c0_4] : memref<1x512xf32, #tpu.memory_space<vmem>>, vector<1x512xf32>
    %4 = vector.broadcast %3 : vector<1x512xf32> to vector<8x512xf32>
    %5 = arith.addf %2, %4 : vector<8x512xf32>
    %cst_5 = arith.constant 0.000000e+00 : f32
    %6 = vector.broadcast %cst_5 : f32 to vector<8x512xf32>
    %7 = arith.maximumf %5, %6 : vector<8x512xf32>
    %c0_6 = arith.constant 0 : index
    %c0_7 = arith.constant 0 : index
    %8 = vector.load %arg4[%c0_6, %c0_7] : memref<512x128xf32, #tpu.memory_space<vmem>>, vector<512x128xf32>
    %cst_8 = arith.constant dense<0.000000e+00> : vector<8x128xf32>
    %9 = tpu.matmul %7, %8, %cst_8 {dimension_numbers = #tpu.dot_dimension_numbers<[1], [0], [0], [1], [0, 0, 1, 1], [], []>} : vector<8x512xf32>, vector<512x128xf32>, vector<8x128xf32> -> vector<8x128xf32>
    %c0_9 = arith.constant 0 : index
    %c0_10 = arith.constant 0 : index
    %10 = vector.load %arg5[%c0_9, %c0_10] : memref<1x128xf32, #tpu.memory_space<vmem>>, vector<1x128xf32>
    %11 = vector.broadcast %10 : vector<1x128xf32> to vector<8x128xf32>
    %12 = arith.addf %9, %11 : vector<8x128xf32>
    %c0_11 = arith.constant 0 : index
    %c0_12 = arith.constant 0 : index
    %13 = vector.load %arg6[%c0_11, %c0_12] : memref<8x128xf32, #tpu.memory_space<vmem>>, vector<8x128xf32>
    tpu.vector_store %arg6[%c0_11, %c0_12], %12 {strides = array<i32>} : memref<8x128xf32, #tpu.memory_space<vmem>>, vector<8x128xf32>,
    return
  }
  func.func @transform_0(%arg0: i32) -> (i32, i32) {
    %c0_i32 = arith.constant 0 : i32
    %c0_i32_0 = arith.constant 0 : i32
    return %arg0, %c0_i32 : i32, i32
  }
  func.func @transform_1(%arg0: i32) -> (i32, i32) {
    %c0_i32 = arith.constant 0 : i32
    %c0_i32_0 = arith.constant 0 : i32
    %c0_i32_1 = arith.constant 0 : i32
    return %c0_i32, %c0_i32_0 : i32, i32
  }
  func.func @transform_2(%arg0: i32) -> (i32, i32) {
    %c0_i32 = arith.constant 0 : i32
    %c0_i32_0 = arith.constant 0 : i32
    %c0_i32_1 = arith.constant 0 : i32
    return %c0_i32, %c0_i32_0 : i32, i32
  }
  func.func @transform_3(%arg0: i32) -> (i32, i32) {
    %c0_i32 = arith.constant 0 : i32
    %c0_i32_0 = arith.constant 0 : i32
    %c0_i32_1 = arith.constant 0 : i32
    return %c0_i32, %c0_i32_0 : i32, i32
  }
  func.func @transform_4(%arg0: i32) -> (i32, i32) {
    %c0_i32 = arith.constant 0 : i32
    %c0_i32_0 = arith.constant 0 : i32
    %c0_i32_1 = arith.constant 0 : i32
    return %c0_i32, %c0_i32_0 : i32, i32
  }
  func.func @transform_5(%arg0: i32) -> (i32, i32) {
    %c0_i32 = arith.constant 0 : i32
    %c0_i32_0 = arith.constant 0 : i32
    return %arg0, %c0_i32 : i32, i32
  }
}

</mosaic_0001>

<bundles_post_ra>
// kernel: tpu_custom_call.1
= control target key start
LH: loop header
LB: loop body
LE: loop exit
PB: predicated region body
PF: predicated region fallthrough
CT: control target
= control target key end

     0   :  { %10 = vsyncpa [#allocation3], 0  ;;  %s1358_s0 = inlined_call_operand.hbm [shape: f32[16,256], index: 0, kind: input, shape index: {}]   ;;  %s1359_s1 = inlined_call_operand.hbm [shape: f32[256,512], index: 1, kind: input, shape index: {}]   ;;  %s1360_s2 = inlined_call_operand.hbm [shape: f32[1,512], index: 2, kind: input, shape index: {}]   ;;  %s1361_s3 = inlined_call_operand.hbm [shape: f32[512,128], index: 3, kind: input, shape index: {}]   ;;  %s1362_s4 = inlined_call_operand.vmem [shape: f32[1,128], index: 4, kind: input, shape index: {}]   ;;  %s1363_s5 = inlined_call_operand.hbm [shape: f32[16,128], index: 5, kind: output, shape index: {}]  }
   0x1   :  { %12 = vsyncpa [#allocation3 + $0x1], 0 }
   0x2   :  { %13 = vsyncpa [#allocation6], 0 }
   0x3   :  { %14 = vsyncpa [#allocation9], 0 }
   0x4   :  { %15 = vsyncpa [#allocation4], 0 }
   0x5   :  { %17 = vsyncpa [#allocation4 + $0x1], 0  ;;  %s1194_s18 = smov 0   ;;  %s1196_s19 = smov 0  }
   0x6   :  { %s1198_s20 = smov 0   ;;  %s1200_s21 = smov 0  }
   0x7 LB: > { %s175_s24 = sshll.u32 %s1359_s1, 4  ;;  %s1218_s25 = sadd.s32 4294967295, %s1155_s21   ;;  %s1155_s21 = sphi %s1200_s21, %s1374_s21   ;;  %s1151_s20 = sphi %s1198_s20, %s1373_s20   ;;  %s1147_s19 = sphi %s1196_s19, %s1372_s19   ;;  %s1143_s18 = sphi %s1194_s18, %s1371_s18   ;;  %s176_s24 = int_to_ptr.hbm [resolvable:$true] %s175_s24 }
   0x8   : > { %p860_p0 = scmp.ge.s32.totalorder %s1155_s21, 1  ;;  %p44_p1 = scmp.eq.s32.totalorder %s1218_s25, 0 }
   0x9   : > { %p164_p2 = scmp.lt.s32.totalorder %s1155_s21, 3  ;;  %s1157_s27 = smov [#allocation5]  }
   0xa   : > { %s177_s28 = sshll.u32 %s1157_s27, 4  ;;  %s190_s6 = sshll.u32 %s1360_s2, 4  ;;  %s178_s28 = int_to_ptr.vmem [resolvable:$true] %s177_s28  ;;  %s191_s6 = int_to_ptr.hbm [resolvable:$true] %s190_s6 }
   0xb   : > { %p1223_p3 = pnand %p860_p0, %p164_p2  ;;  %s201_s10 = sshll.u32 %s1361_s3, 4  ;;  %s202_s10 = int_to_ptr.hbm [resolvable:$true] %s201_s10 }
   0xc   : > { %s1158_s11 = smov [#allocation7]   ;;  %s1159_s13 = smov 512  }
   0xd   : > { %p895_p4 = pneg %p1223_p3  ;;  %s192_s12 = sshll.u32 %s1158_s11, 4  ;;  %s193_s12 = int_to_ptr.vmem [resolvable:$true] %s192_s12 }
   0xe   : > { %s1160_s14 = smov 32   ;;  %s1161_s15 = smov [#allocation8]  }
   0xf   : > { %p1235_p6 = pnand %p895_p4, %p44_p1  ;;  %s203_s16 = sshll.u32 %s1161_s15, 4  ;;  %s204_s16 = int_to_ptr.vmem [resolvable:$true] %s203_s16 }
  0x10   : > { %s1162_s17 = smov 128   ;;  %s1163_s22 = smov 8  }
  0x11   : > { %898 = dma.hbm_to_vmem [thread:$0]  (!%p1235_p6), %s176_s24, 16384, %s178_s28, [#allocation6], %s1159_s13, %s1159_s13, %s1160_s14  }
  0x12   : > { %901 = dma.hbm_to_vmem [thread:$0]  (!%p1235_p6), %s191_s6, 64, %s193_s12, [#allocation6]  }
  0x13   : > { %904 = dma.hbm_to_vmem [thread:$0]  (!%p1235_p6), %s202_s10, 8192, %s204_s16, [#allocation9], %s1162_s17, %s1162_s17, %s1163_s22  }
  0x14   : > { %s859_s23 = sadd.s32 4294967294, %s1155_s21   ;;  %s1250_s24 = sadd.s32 1, %s1155_s21  }
  0x15   : > { %s30_s27 = sadd.s32 1, %s1151_s20  ;;  %s27_s28 = ssub.s32 %s1155_s21, %s1250_s24 }
  0x16   : > { %p37_p7 = scmp.ne.s32.totalorder %s1151_s20, %s1147_s19  ;;  %p28_p8 = scmp.eq.s32.totalorder %s27_s28, 0 }
  0x17   : > { %p38_p9 = scmp.eq.s32.totalorder %s1155_s21, 0  ;;  %p43_p10 = scmp.ne.s32.totalorder %s1147_s19, %s1143_s18 }
  0x18   : > { %p151_p11 = scmp.eq.s32.totalorder %s1218_s25, 1  ;;  %p157_p0 = scmp.eq.s32.totalorder %s859_s23, 1 }
  0x19   : > { %s1262_s29 = scalar_select %p28_p8, %s1151_s20, %s30_s27  }
  0x1a   : > { %p1266_p12 = por %p44_p1, %p43_p10  ;;  %p1270_p13 = por %p151_p11, %p37_p7 }
  0x1b   : > { %p39_p2 = por %p38_p9, %p37_p7  ;;  %s220_s7 = sand.u32 1, %s1151_s20  }
  0x1c   : > { %p1275_p4 = por %p157_p0, %p43_p10  ;;  %p916_p6 = scmp.lt.s32.totalorder %s1155_s21, 2 }
  0x1d   : > { %s865_s9 = sshll.u32 %s220_s7, 4  ;;  %s878_s10 = sshll.u32 %s1155_s21, 4 }
  0x1e   : > { %s229_s13 = scalar_lea.hbm %s1358_s0, %s878_s10  ;;  %s224_s15 = scalar_lea.vmem [#allocation2], %s865_s9 }
  0x1f   : > { %s231_s14 = sshll.u32 %s229_s13, 4  ;;  %s233_s16 = sshll.u32 %s224_s15, 4  ;;  %s232_s14 = int_to_ptr.hbm [resolvable:$true] %s231_s14  ;;  %s234_s16 = int_to_ptr.vmem [resolvable:$true] %s233_s16 }
  0x20   : > { %p1284_p8 = pnand %p916_p6, %p39_p2  ;;  %s221_s22 = scalar_lea.sflag [#allocation3], %s220_s7 }
  0x21   : > { %s1051_s23 = sshra.s32 %s232_s14, 4  ;;  %s1058_s9 = scalar_lea.hbm %s1358_s0, 32  ;;  %s1052_s23 = int_to_ptr.hbm [resolvable:$true] %s1051_s23 }
  0x22   : > { %s1053_s27 = scalar_lea.hbm %s1052_s23, 16  ;;  %p1055_p9 = pneg %p1284_p8 }
  0x23   : > { %p1054_p7 = scmp.ne.s32.totalorder %s1052_s23, %s1053_s27  ;;  %p1059_p0 = scmp.lt.s32.totalorder %s1052_s23, %s1358_s0 }
  0x24   : > { %p1060_p2 = scmp.lt.s32.totalorder %s1058_s9, %s1053_s27 }
  0x25   : > { %p1056_p10 = pnand %p1055_p9, %p1054_p7 }
  0x26   : > { %p1061_p6 = por %p1060_p2, %p1059_p0 }
  0x27   : > { %p1057_p11 = pneg %p1056_p10 }
  0x29   : > { %p1062_p5 = pnand %p1061_p6, %p1057_p11 }
  0x2b   : > { %1065 = shalt.err (!%p1062_p5)
}
  0x2c   : > { %908 = dma.hbm_to_vmem [thread:$0]  (!%p1284_p8), %s232_s14, 256, %s234_s16, %s221_s22  }
  0x2d   : > { %242 = sbr.rel (%p1223_p3) target bundleno = 397 (0x18d), region = 40  ;;  %s1301_s7 = sand.u32 (!%p1223_p3), 1, %s1147_s19  }
  0x2e   : > { %s869_s13 = sshll.u32 (!%p1223_p3), %s1301_s7, 4  ;;  %s245_s15 = scalar_lea.sflag (!%p1223_p3), [#allocation3], %s1301_s7 }
  0x2f   : > { %s1305_s28 = scalar_lea.vmem (!%p1223_p3), [#allocation2], %s869_s13 }
  0x32   : > { %1126 = dma.done.wait (%p1266_p12), %s245_s15, 256  }
  0x33   : > { %1128 = vsyncadd (%p1266_p12), %s245_s15, 4294967040 }
  0x34   : > { %1130 = dma.done.wait (%p44_p1), [#allocation6], 16448  }
  0x35   : > { %1132 = vsyncadd (%p44_p1), [#allocation6], 4294950848 }
  0x36   : > { %1134 = dma.done.wait (%p44_p1), [#allocation9], 8192  }
  0x37   : > { %1136 = vsyncadd (%p44_p1), [#allocation9], 4294959104  ;;  %v353_v0 = vld [vmem:[#allocation5 + $0x1e0] sm:$0xff]  ;;  %v354_v1 = vld [vmem:[#allocation5 + $0x1e8] sm:$0xff]  ;;  %s873_s14 = sshll.u32 %s1301_s7, 3  ;;  %s875_s16 = sshll.u32 %s1218_s25, 3 }
  0x38   : > { %v349_v2 = vld [vmem:[#allocation5 + $0x1c0] sm:$0xff]  ;;  %431 = vmatpush.msra.mxu0 %v353_v0  ;;  %471 = vmatpush.msra.mxu2 %v354_v1  ;;  %v350_v4 = vld [vmem:[#allocation5 + $0x1c8] sm:$0xff]  ;;  %v355_v62 = vld [vmem:[#allocation5 + $0x1f0] sm:$0xff]  ;;  %s755_s23 = scalar_lea.hbm %s1363_s5, %s875_s16  ;;  %s290_s27 = scalar_lea.vmem [#allocation10], %s873_s14 }
  0x39   : > { %v417_v3 = vld [vmem:[#allocation5 + $0x3e0] sm:$0xff]  ;;  %v418_v5 = vld [vmem:[#allocation5 + $0x3e8] sm:$0xff]  ;;  %v356_v63 = vld [vmem:[#allocation5 + $0x1f8] sm:$0xff]  ;;  %s757_s10 = sshll.u32 %s290_s27, 4  ;;  %s759_s9 = sshll.u32 %s755_s23, 4  ;;  %s758_s10 = int_to_ptr.vmem [resolvable:$true] %s757_s10  ;;  %s760_s9 = int_to_ptr.hbm [resolvable:$true] %s759_s9 }
  0x3a   : > { %451 = vmatpush.msra.mxu1 %v417_v3  ;;  %491 = vmatpush.msra.mxu3 %v418_v5  ;;  %v345_v6 = vld [vmem:[#allocation5 + $0x1a0] sm:$0xff]  ;;  %v346_v8 = vld [vmem:[#allocation5 + $0x1a8] sm:$0xff]  ;;  %v419_v3 = vld [vmem:[#allocation5 + $0x3f0] sm:$0xff]  ;;  %s745_s11 = scalar_lea.sflag [#allocation4], %s1301_s7  ;;  %s1095_s25 = sshra.s32 %s760_s9, 4  ;;  %s1096_s25 = int_to_ptr.hbm [resolvable:$true] %s1095_s25 }
  0x3b   : > { %v413_v7 = vld [vmem:[#allocation5 + $0x3c0] sm:$0xff]  ;;  %432 = vmatpush.msra.mxu0 %v349_v2  ;;  %472 = vmatpush.msra.mxu2 %v350_v4  ;;  %v414_v9 = vld [vmem:[#allocation5 + $0x3c8] sm:$0xff]  ;;  %v351_v2 = vld [vmem:[#allocation5 + $0x1d0] sm:$0xff]  ;;  %s1097_s12 = scalar_lea.hbm %s1096_s25, 8  ;;  %p1102_p12 = scmp.lt.s32.totalorder %s1096_s25, %s1363_s5 }
  0x3c   : > { %v409_v10 = vld [vmem:[#allocation5 + $0x3a0] sm:$0xff]  ;;  %452 = vmatpush.msra.mxu1 %v413_v7  ;;  %492 = vmatpush.msra.mxu3 %v414_v9  ;;  %v342_v12 = vld [vmem:[#allocation5 + $0x188] sm:$0xff]  ;;  %v352_v4 = vld [vmem:[#allocation5 + $0x1d8] sm:$0xff]  ;;  %p1098_p1 = scmp.ne.s32.totalorder %s1096_s25, %s1097_s12 }
  0x3d   : > { %v341_v11 = vld [vmem:[#allocation5 + $0x180] sm:$0xff]  ;;  %v410_v13 = vld [vmem:[#allocation5 + $0x3a8] sm:$0xff]  ;;  %433 = vmatpush.msra.mxu0 %v345_v6  ;;  %473 = vmatpush.msra.mxu2 %v346_v8  ;;  %v420_v5 = vld [vmem:[#allocation5 + $0x3f8] sm:$0xff] }
  0x3e   : > { %v405_v14 = vld [vmem:[#allocation5 + $0x380] sm:$0xff]  ;;  %v406_v15 = vld [vmem:[#allocation5 + $0x388] sm:$0xff]  ;;  %453 = vmatpush.msra.mxu1 %v409_v10  ;;  %493 = vmatpush.msra.mxu3 %v410_v13  ;;  %v347_v6 = vld [vmem:[#allocation5 + $0x1b0] sm:$0xff]  ;;  %p1099_p3 = pnand %p1098_p1, %p1270_p13 }
  0x3f   : > { %v337_v16 = vld [vmem:[#allocation5 + $0x160] sm:$0xff]  ;;  %v338_v17 = vld [vmem:[#allocation5 + $0x168] sm:$0xff]  ;;  %434 = vmatpush.msra.mxu0 %v341_v11  ;;  %474 = vmatpush.msra.mxu2 %v342_v12  ;;  %v415_v7 = vld [vmem:[#allocation5 + $0x3d0] sm:$0xff] }
  0x40   : > { %v401_v18 = vld [vmem:[#allocation5 + $0x360] sm:$0xff]  ;;  %v402_v19 = vld [vmem:[#allocation5 + $0x368] sm:$0xff]  ;;  %454 = vmatpush.msra.mxu1 %v405_v14  ;;  %494 = vmatpush.msra.mxu3 %v406_v15  ;;  %v348_v8 = vld [vmem:[#allocation5 + $0x1b8] sm:$0xff]  ;;  %p1100_p5 = pneg %p1099_p3 }
  0x41   : > { %v333_v20 = vld [vmem:[#allocation5 + $0x140] sm:$0xff]  ;;  %v334_v21 = vld [vmem:[#allocation5 + $0x148] sm:$0xff]  ;;  %435 = vmatpush.msra.mxu0 %v337_v16  ;;  %475 = vmatpush.msra.mxu2 %v338_v17  ;;  %v416_v9 = vld [vmem:[#allocation5 + $0x3d8] sm:$0xff] }
  0x42   : > { %v397_v22 = vld [vmem:[#allocation5 + $0x340] sm:$0xff]  ;;  %v398_v23 = vld [vmem:[#allocation5 + $0x348] sm:$0xff]  ;;  %455 = vmatpush.msra.mxu1 %v401_v18  ;;  %495 = vmatpush.msra.mxu3 %v402_v19  ;;  %v343_v10 = vld [vmem:[#allocation5 + $0x190] sm:$0xff] }
  0x43   : > { %v329_v24 = vld [vmem:[#allocation5 + $0x120] sm:$0xff]  ;;  %v330_v25 = vld [vmem:[#allocation5 + $0x128] sm:$0xff]  ;;  %436 = vmatpush.msra.mxu0 %v333_v20  ;;  %476 = vmatpush.msra.mxu2 %v334_v21  ;;  %v411_v11 = vld [vmem:[#allocation5 + $0x3b0] sm:$0xff] }
  0x44   : > { %v393_v26 = vld [vmem:[#allocation5 + $0x320] sm:$0xff]  ;;  %v394_v27 = vld [vmem:[#allocation5 + $0x328] sm:$0xff]  ;;  %456 = vmatpush.msra.mxu1 %v397_v22  ;;  %496 = vmatpush.msra.mxu3 %v398_v23  ;;  %v344_v12 = vld [vmem:[#allocation5 + $0x198] sm:$0xff] }
  0x45   : > { %v325_v28 = vld [vmem:[#allocation5 + $0x100] sm:$0xff]  ;;  %v326_v29 = vld [vmem:[#allocation5 + $0x108] sm:$0xff]  ;;  %437 = vmatpush.msra.mxu0 %v329_v24  ;;  %477 = vmatpush.msra.mxu2 %v330_v25  ;;  %v412_v13 = vld [vmem:[#allocation5 + $0x3b8] sm:$0xff] }
  0x46   : > { %v389_v30 = vld [vmem:[#allocation5 + $0x300] sm:$0xff]  ;;  %v390_v31 = vld [vmem:[#allocation5 + $0x308] sm:$0xff]  ;;  %457 = vmatpush.msra.mxu1 %v393_v26  ;;  %497 = vmatpush.msra.mxu3 %v394_v27  ;;  %v339_v14 = vld [vmem:[#allocation5 + $0x170] sm:$0xff] }
  0x47   : > { %v321_v32 = vld [vmem:[#allocation5 + $0xe0] sm:$0xff]  ;;  %v322_v33 = vld [vmem:[#allocation5 + $0xe8] sm:$0xff]  ;;  %438 = vmatpush.msra.mxu0 %v325_v28  ;;  %478 = vmatpush.msra.mxu2 %v326_v29  ;;  %v407_v15 = vld [vmem:[#allocation5 + $0x390] sm:$0xff] }
  0x48   : > { %v385_v34 = vld [vmem:[#allocation5 + $0x2e0] sm:$0xff]  ;;  %v386_v35 = vld [vmem:[#allocation5 + $0x2e8] sm:$0xff]  ;;  %458 = vmatpush.msra.mxu1 %v389_v30  ;;  %498 = vmatpush.msra.mxu3 %v390_v31  ;;  %v340_v16 = vld [vmem:[#allocation5 + $0x178] sm:$0xff] }
  0x49   : > { %v317_v36 = vld [vmem:[#allocation5 + $0xc0] sm:$0xff]  ;;  %v318_v37 = vld [vmem:[#allocation5 + $0xc8] sm:$0xff]  ;;  %439 = vmatpush.msra.mxu0 %v321_v32  ;;  %479 = vmatpush.msra.mxu2 %v322_v33  ;;  %v408_v17 = vld [vmem:[#allocation5 + $0x398] sm:$0xff] }
  0x4a   : > { %v381_v38 = vld [vmem:[#allocation5 + $0x2c0] sm:$0xff]  ;;  %v382_v39 = vld [vmem:[#allocation5 + $0x2c8] sm:$0xff]  ;;  %459 = vmatpush.msra.mxu1 %v385_v34  ;;  %499 = vmatpush.msra.mxu3 %v386_v35  ;;  %v335_v18 = vld [vmem:[#allocation5 + $0x150] sm:$0xff] }
  0x4b   : > { %v313_v40 = vld [vmem:[#allocation5 + $0xa0] sm:$0xff]  ;;  %v314_v41 = vld [vmem:[#allocation5 + $0xa8] sm:$0xff]  ;;  %440 = vmatpush.msra.mxu0 %v317_v36  ;;  %480 = vmatpush.msra.mxu2 %v318_v37  ;;  %v403_v19 = vld [vmem:[#allocation5 + $0x370] sm:$0xff] }
  0x4c   : > { %v377_v42 = vld [vmem:[#allocation5 + $0x2a0] sm:$0xff]  ;;  %v378_v43 = vld [vmem:[#allocation5 + $0x2a8] sm:$0xff]  ;;  %460 = vmatpush.msra.mxu1 %v381_v38  ;;  %500 = vmatpush.msra.mxu3 %v382_v39  ;;  %v336_v20 = vld [vmem:[#allocation5 + $0x158] sm:$0xff] }
  0x4d   : > { %v309_v44 = vld [vmem:[#allocation5 + $0x80] sm:$0xff]  ;;  %v310_v45 = vld [vmem:[#allocation5 + $0x88] sm:$0xff]  ;;  %441 = vmatpush.msra.mxu0 %v313_v40  ;;  %481 = vmatpush.msra.mxu2 %v314_v41  ;;  %v404_v21 = vld [vmem:[#allocation5 + $0x378] sm:$0xff] }
  0x4e   : > { %v373_v46 = vld [vmem:[#allocation5 + $0x280] sm:$0xff]  ;;  %v374_v47 = vld [vmem:[#allocation5 + $0x288] sm:$0xff]  ;;  %461 = vmatpush.msra.mxu1 %v377_v42  ;;  %501 = vmatpush.msra.mxu3 %v378_v43  ;;  %v331_v22 = vld [vmem:[#allocation5 + $0x130] sm:$0xff] }
  0x4f   : > { %v305_v48 = vld [vmem:[#allocation5 + $0x60] sm:$0xff]  ;;  %v306_v49 = vld [vmem:[#allocation5 + $0x68] sm:$0xff]  ;;  %442 = vmatpush.msra.mxu0 %v309_v44  ;;  %482 = vmatpush.msra.mxu2 %v310_v45  ;;  %v399_v23 = vld [vmem:[#allocation5 + $0x350] sm:$0xff] }
  0x50   : > { %v369_v50 = vld [vmem:[#allocation5 + $0x260] sm:$0xff]  ;;  %v370_v51 = vld [vmem:[#allocation5 + $0x268] sm:$0xff]  ;;  %462 = vmatpush.msra.mxu1 %v373_v46  ;;  %502 = vmatpush.msra.mxu3 %v374_v47  ;;  %v332_v24 = vld [vmem:[#allocation5 + $0x138] sm:$0xff] }
  0x51   : > { %v301_v52 = vld [vmem:[#allocation5 + $0x40] sm:$0xff]  ;;  %v302_v53 = vld [vmem:[#allocation5 + $0x48] sm:$0xff]  ;;  %443 = vmatpush.msra.mxu0 %v305_v48  ;;  %483 = vmatpush.msra.mxu2 %v306_v49  ;;  %v400_v25 = vld [vmem:[#allocation5 + $0x358] sm:$0xff] }
  0x52   : > { %v365_v54 = vld [vmem:[#allocation5 + $0x240] sm:$0xff]  ;;  %v366_v55 = vld [vmem:[#allocation5 + $0x248] sm:$0xff]  ;;  %463 = vmatpush.msra.mxu1 %v369_v50  ;;  %503 = vmatpush.msra.mxu3 %v370_v51  ;;  %v327_v26 = vld [vmem:[#allocation5 + $0x110] sm:$0xff] }
  0x53   : > { %v297_v56 = vld [vmem:[#allocation5 + $0x20] sm:$0xff]  ;;  %v298_v57 = vld [vmem:[#allocation5 + $0x28] sm:$0xff]  ;;  %444 = vmatpush.msra.mxu0 %v301_v52  ;;  %484 = vmatpush.msra.mxu2 %v302_v53  ;;  %v395_v27 = vld [vmem:[#allocation5 + $0x330] sm:$0xff] }
  0x54   : > { %v361_v58 = vld [vmem:[#allocation5 + $0x220] sm:$0xff]  ;;  %v362_v59 = vld [vmem:[#allocation5 + $0x228] sm:$0xff]  ;;  %464 = vmatpush.msra.mxu1 %v365_v54  ;;  %504 = vmatpush.msra.mxu3 %v366_v55  ;;  %v328_v28 = vld [vmem:[#allocation5 + $0x118] sm:$0xff] }
  0x55   : > { %v293_v60 = vld [vmem:[#allocation5] sm:$0xff]  ;;  %v294_v61 = vld [vmem:[#allocation5 + $0x8] sm:$0xff]  ;;  %445 = vmatpush.msra.mxu0 %v297_v56  ;;  %485 = vmatpush.msra.mxu2 %v298_v57  ;;  %v396_v29 = vld [vmem:[#allocation5 + $0x338] sm:$0xff] }
  0x56   : > { %465 = vmatpush.msra.mxu1 %v361_v58  ;;  %505 = vmatpush.msra.mxu3 %v362_v59  ;;  %v357_v0 = vld [vmem:[#allocation5 + $0x200] sm:$0xff]  ;;  %v358_v1 = vld [vmem:[#allocation5 + $0x208] sm:$0xff]  ;;  %v323_v30 = vld [vmem:[#allocation5 + $0xf0] sm:$0xff] }
  0x57   : > { %446 = vmatpush.msra.mxu0 %v293_v60  ;;  %486 = vmatpush.msra.mxu2 %v294_v61  ;;  %v391_v31 = vld [vmem:[#allocation5 + $0x310] sm:$0xff]  ;;  %v324_v32 = vld [vmem:[#allocation5 + $0xf8] sm:$0xff] }
  0x58   : > { %466 = vmatpush.msra.mxu1 %v357_v0  ;;  %506 = vmatpush.msra.mxu3 %v358_v1  ;;  %v392_v33 = vld [vmem:[#allocation5 + $0x318] sm:$0xff]  ;;  %v319_v34 = vld [vmem:[#allocation5 + $0xd0] sm:$0xff] }
  0x59   : > { %511 = vmatpush.msrb.mxu0 %v355_v62  ;;  %551 = vmatpush.msrb.mxu2 %v356_v63  ;;  %v387_v35 = vld [vmem:[#allocation5 + $0x2f0] sm:$0xff]  ;;  %v320_v36 = vld [vmem:[#allocation5 + $0xd8] sm:$0xff] }
  0x5a   : > { %531 = vmatpush.msrb.mxu1 %v419_v3  ;;  %571 = vmatpush.msrb.mxu3 %v420_v5  ;;  %v388_v37 = vld [vmem:[#allocation5 + $0x2f8] sm:$0xff]  ;;  %v315_v38 = vld [vmem:[#allocation5 + $0xb0] sm:$0xff] }
  0x5b   : > { %512 = vmatpush.msrb.mxu0 %v351_v2  ;;  %552 = vmatpush.msrb.mxu2 %v352_v4  ;;  %v383_v39 = vld [vmem:[#allocation5 + $0x2d0] sm:$0xff]  ;;  %v316_v40 = vld [vmem:[#allocation5 + $0xb8] sm:$0xff] }
  0x5c   : > { %532 = vmatpush.msrb.mxu1 %v415_v7  ;;  %572 = vmatpush.msrb.mxu3 %v416_v9  ;;  %v384_v41 = vld [vmem:[#allocation5 + $0x2d8] sm:$0xff]  ;;  %v311_v42 = vld [vmem:[#allocation5 + $0x90] sm:$0xff] }
  0x5d   : > { %513 = vmatpush.msrb.mxu0 %v347_v6  ;;  %553 = vmatpush.msrb.mxu2 %v348_v8  ;;  %v379_v43 = vld [vmem:[#allocation5 + $0x2b0] sm:$0xff]  ;;  %v312_v44 = vld [vmem:[#allocation5 + $0x98] sm:$0xff] }
  0x5e   : > { %533 = vmatpush.msrb.mxu1 %v411_v11  ;;  %573 = vmatpush.msrb.mxu3 %v412_v13  ;;  %v380_v45 = vld [vmem:[#allocation5 + $0x2b8] sm:$0xff]  ;;  %v291_v46 = vld [vmem:[%s1305_s28] sm:$0xff] }
  0x5f   : > { %514 = vmatpush.msrb.mxu0 %v343_v10  ;;  %554 = vmatpush.msrb.mxu2 %v344_v12  ;;  %v307_v47 = vld [vmem:[#allocation5 + $0x70] sm:$0xff]  ;;  %v308_v49 = vld [vmem:[#allocation5 + $0x78] sm:$0xff] }
  0x60   : > { %534 = vmatpush.msrb.mxu1 %v407_v15  ;;  %574 = vmatpush.msrb.mxu3 %v408_v17  ;;  %v375_v48 = vld [vmem:[#allocation5 + $0x290] sm:$0xff]  ;;  %v376_v50 = vld [vmem:[#allocation5 + $0x298] sm:$0xff]  ;;  %v623_v15 = vld [vmem:[#allocation8 + $0xe0] sm:$0xff] }
  0x61   : > { %515 = vmatpush.msrb.mxu0 %v339_v14  ;;  %555 = vmatpush.msrb.mxu2 %v340_v16  ;;  %v292_v51 = vld [vmem:[%s1305_s28 + $0x8] sm:$0xff]  ;;  %v303_v52 = vld [vmem:[#allocation5 + $0x50] sm:$0xff]  ;;  %s1101_s28 = scalar_lea.hbm %s1363_s5, 16 }
  0x62   : > { %535 = vmatpush.msrb.mxu1 %v403_v19  ;;  %575 = vmatpush.msrb.mxu3 %v404_v21  ;;  %v371_v53 = vld [vmem:[#allocation5 + $0x270] sm:$0xff]  ;;  %v304_v54 = vld [vmem:[#allocation5 + $0x58] sm:$0xff]  ;;  %v607_v14 = vld [vmem:[#allocation8 + $0x60] sm:$0xff]  ;;  %p1103_p8 = scmp.lt.s32.totalorder %s1101_s28, %s1097_s12 }
  0x63   : > { %516 = vmatpush.msrb.mxu0 %v335_v18  ;;  %556 = vmatpush.msrb.mxu2 %v336_v20  ;;  %v372_v55 = vld [vmem:[#allocation5 + $0x278] sm:$0xff]  ;;  %v299_v56 = vld [vmem:[#allocation5 + $0x30] sm:$0xff]  ;;  %v639_v16 = vld [vmem:[#allocation8 + $0x160] sm:$0xff] }
  0x64   : > { %536 = vmatpush.msrb.mxu1 %v399_v23  ;;  %576 = vmatpush.msrb.mxu3 %v400_v25  ;;  %v367_v57 = vld [vmem:[#allocation5 + $0x250] sm:$0xff]  ;;  %v300_v58 = vld [vmem:[#allocation5 + $0x38] sm:$0xff]  ;;  %v655_v17 = vld [vmem:[#allocation8 + $0x1e0] sm:$0xff]  ;;  %p1104_p7 = por %p1103_p8, %p1102_p12 }
  0x65   : > { %517 = vmatpush.msrb.mxu0 %v331_v22  ;;  %557 = vmatpush.msrb.mxu2 %v332_v24  ;;  %v368_v59 = vld [vmem:[#allocation5 + $0x258] sm:$0xff]  ;;  %v295_v60 = vld [vmem:[#allocation5 + $0x10] sm:$0xff] }
  0x66   : > { %537 = vmatpush.msrb.mxu1 %v395_v27  ;;  %577 = vmatpush.msrb.mxu3 %v396_v29  ;;  %v363_v61 = vld [vmem:[#allocation5 + $0x230] sm:$0xff]  ;;  %v296_v62 = vld [vmem:[#allocation5 + $0x18] sm:$0xff]  ;;  %v619_v29 = vld [vmem:[#allocation8 + $0xc0] sm:$0xff]  ;;  %p1105_p9 = pnand %p1104_p7, %p1100_p5 }
  0x67   : > { %518 = vmatpush.msrb.mxu0 %v327_v26  ;;  %558 = vmatpush.msrb.mxu2 %v328_v28  ;;  %v364_v63 = vld [vmem:[#allocation5 + $0x238] sm:$0xff]  ;;  %v359_v0 = vld [vmem:[#allocation5 + $0x210] sm:$0xff]  ;;  %v603_v28 = vld [vmem:[#allocation8 + $0x40] sm:$0xff] }
  0x68   : > { %538 = vmatpush.msrb.mxu1 %v391_v31  ;;  %578 = vmatpush.msrb.mxu3 %v392_v33  ;;  %v360_v1 = vld [vmem:[#allocation5 + $0x218] sm:$0xff]  ;;  %v608_v10 = vld [vmem:[#allocation8 + $0x68] sm:$0xff] }
  0x69   : > { %519 = vmatpush.msrb.mxu0 %v323_v30  ;;  %559 = vmatpush.msrb.mxu2 %v324_v32  ;;  %v610_v2 = vld [vmem:[#allocation8 + $0x78] sm:$0xff]  ;;  %v609_v6 = vld [vmem:[#allocation8 + $0x70] sm:$0xff]  ;;  %v624_v11 = vld [vmem:[#allocation8 + $0xe8] sm:$0xff] }
  0x6a   : > { %539 = vmatpush.msrb.mxu1 %v387_v35  ;;  %579 = vmatpush.msrb.mxu3 %v388_v37  ;;  %v626_v3 = vld [vmem:[#allocation8 + $0xf8] sm:$0xff]  ;;  %v625_v7 = vld [vmem:[#allocation8 + $0xf0] sm:$0xff]  ;;  %v640_v12 = vld [vmem:[#allocation8 + $0x168] sm:$0xff] }
  0x6b   : > { %520 = vmatpush.msrb.mxu0 %v319_v34  ;;  %560 = vmatpush.msrb.mxu2 %v320_v36  ;;  %v642_v4 = vld [vmem:[#allocation8 + $0x178] sm:$0xff]  ;;  %v641_v8 = vld [vmem:[#allocation8 + $0x170] sm:$0xff]  ;;  %v656_v13 = vld [vmem:[#allocation8 + $0x1e8] sm:$0xff] }
  0x6c   : > { %540 = vmatpush.msrb.mxu1 %v383_v39  ;;  %580 = vmatpush.msrb.mxu3 %v384_v41  ;;  %v658_v5 = vld [vmem:[#allocation8 + $0x1f8] sm:$0xff]  ;;  %v657_v9 = vld [vmem:[#allocation8 + $0x1f0] sm:$0xff]  ;;  %v604_v25 = vld [vmem:[#allocation8 + $0x48] sm:$0xff] }
  0x6d   : > { %521 = vmatpush.msrb.mxu0 %v315_v38  ;;  %561 = vmatpush.msrb.mxu2 %v316_v40  ;;  %v606_v18 = vld [vmem:[#allocation8 + $0x58] sm:$0xff]  ;;  %v605_v22 = vld [vmem:[#allocation8 + $0x50] sm:$0xff]  ;;  %v620_v26 = vld [vmem:[#allocation8 + $0xc8] sm:$0xff] }
  0x6e   : > { %541 = vmatpush.msrb.mxu1 %v379_v43  ;;  %581 = vmatpush.msrb.mxu3 %v380_v45  ;;  %v622_v19 = vld [vmem:[#allocation8 + $0xd8] sm:$0xff]  ;;  %v621_v23 = vld [vmem:[#allocation8 + $0xd0] sm:$0xff]  ;;  %v636_v27 = vld [vmem:[#allocation8 + $0x148] sm:$0xff] }
  0x6f   : > { %522 = vmatpush.msrb.mxu0 %v311_v42  ;;  %562 = vmatpush.msrb.mxu2 %v312_v44  ;;  %v638_v20 = vld [vmem:[#allocation8 + $0x158] sm:$0xff]  ;;  %v637_v24 = vld [vmem:[#allocation8 + $0x150] sm:$0xff]  ;;  %v635_v30 = vld [vmem:[#allocation8 + $0x140] sm:$0xff] }
  0x70   : > { %447 = vmatmul.f32.vlgmr.msra.gmra.mxu0 %v291_v46  ;;  %487 = vmatmul.f32.vlgmr.msra.gmra.mxu2 %v291_v46  ;;  %v654_v21 = vld [vmem:[#allocation8 + $0x1d8] sm:$0xff]  ;;  %v601_v33 = vld [vmem:[#allocation8 + $0x30] sm:$0xff]  ;;  %v600_v34 = vld [vmem:[#allocation8 + $0x28] sm:$0xff] }
  0x71   : > { %523 = vmatpush.msrb.mxu0 %v307_v47  ;;  %542 = vmatpush.msrb.mxu1 %v375_v48  ;;  %v602_v31 = vld [vmem:[#allocation8 + $0x38] sm:$0xff]  ;;  %v617_v35 = vld [vmem:[#allocation8 + $0xb0] sm:$0xff]  ;;  %v599_v38 = vld [vmem:[#allocation8 + $0x20] sm:$0xff] }
  0x72   : > { %563 = vmatpush.msrb.mxu2 %v308_v49  ;;  %582 = vmatpush.msrb.mxu3 %v376_v50  ;;  %v618_v32 = vld [vmem:[#allocation8 + $0xb8] sm:$0xff]  ;;  %v653_v37 = vld [vmem:[#allocation8 + $0x1d0] sm:$0xff]  ;;  %v616_v39 = vld [vmem:[#allocation8 + $0xa8] sm:$0xff] }
  0x73   : > { %467 = vmatmul.f32.vlgmr.msra.gmra.mxu1 %v292_v51  ;;  %507 = vmatmul.f32.vlgmr.msra.gmra.mxu3 %v292_v51  ;;  %v634_v36 = vld [vmem:[#allocation8 + $0x138] sm:$0xff]  ;;  %v633_v40 = vld [vmem:[#allocation8 + $0x130] sm:$0xff]  ;;  %v652_v41 = vld [vmem:[#allocation8 + $0x1c8] sm:$0xff] }
  0x74   : > { %524 = vmatpush.msrb.mxu0 %v303_v52  ;;  %543 = vmatpush.msrb.mxu1 %v371_v53  ;;  %v598_v42 = vld [vmem:[#allocation8 + $0x18] sm:$0xff]  ;;  %v615_v43 = vld [vmem:[#allocation8 + $0xa0] sm:$0xff]  ;;  %v632_v44 = vld [vmem:[#allocation8 + $0x128] sm:$0xff] }
  0x75   : > { %564 = vmatpush.msrb.mxu2 %v304_v54  ;;  %583 = vmatpush.msrb.mxu3 %v372_v55  ;;  %v651_v45 = vld [vmem:[#allocation8 + $0x1c0] sm:$0xff]  ;;  %v614_v47 = vld [vmem:[#allocation8 + $0x98] sm:$0xff]  ;;  %v596_v50 = vld [vmem:[#allocation8 + $0x8] sm:$0xff] }
  0x76   : > { %525 = vmatpush.msrb.mxu0 %v299_v56  ;;  %544 = vmatpush.msrb.mxu1 %v367_v57  ;;  %v631_v48 = vld [vmem:[#allocation8 + $0x120] sm:$0xff]  ;;  %v650_v49 = vld [vmem:[#allocation8 + $0x1b8] sm:$0xff]  ;;  %v649_v53 = vld [vmem:[#allocation8 + $0x1b0] sm:$0xff] }
  0x77   : > { %565 = vmatpush.msrb.mxu2 %v300_v58  ;;  %584 = vmatpush.msrb.mxu3 %v368_v59  ;;  %v630_v52 = vld [vmem:[#allocation8 + $0x118] sm:$0xff]  ;;  %v595_v54 = vld [vmem:[#allocation8] sm:$0xff]  ;;  %v612_v55 = vld [vmem:[#allocation8 + $0x88] sm:$0xff] }
  0x78   : > { %526 = vmatpush.msrb.mxu0 %v295_v60  ;;  %545 = vmatpush.msrb.mxu1 %v363_v61  ;;  %v629_v56 = vld [vmem:[#allocation8 + $0x110] sm:$0xff]  ;;  %v648_v57 = vld [vmem:[#allocation8 + $0x1a8] sm:$0xff]  ;;  %v611_v58 = vld [vmem:[#allocation8 + $0x80] sm:$0xff] }
  0x79   : > { %566 = vmatpush.msrb.mxu2 %v296_v62  ;;  %585 = vmatpush.msrb.mxu3 %v364_v63  ;;  %v628_v59 = vld [vmem:[#allocation8 + $0x108] sm:$0xff]  ;;  %v647_v60 = vld [vmem:[#allocation8 + $0x1a0] sm:$0xff]  ;;  %v646_v62 = vld [vmem:[#allocation8 + $0x198] sm:$0xff] }
  0x7a   : > { %527 = vmatmul.f32.vlgmr.msrb.gmra.mxu0 %v291_v46  ;;  %567 = vmatmul.f32.vlgmr.msrb.gmra.mxu2 %v291_v46  ;;  %v597_v46 = vld [vmem:[#allocation8 + $0x10] sm:$0xff]  ;;  %v627_v61 = vld [vmem:[#allocation8 + $0x100] sm:$0xff] }
  0x7b   : > { %546 = vmatpush.msrb.mxu1 %v359_v0  ;;  %586 = vmatpush.msrb.mxu3 %v360_v1  ;;  %v645_v63 = vld [vmem:[#allocation8 + $0x190] sm:$0xff]  ;;  %v644_v0 = vld [vmem:[#allocation8 + $0x188] sm:$0xff]  ;;  %v643_v1 = vld [vmem:[#allocation8 + $0x180] sm:$0xff] }
  0x7c   : > { %547 = vmatmul.f32.vlgmr.msrb.gmra.mxu1 %v292_v51  ;;  %587 = vmatmul.f32.vlgmr.msrb.gmra.mxu3 %v292_v51  ;;  %v613_v51 = vld [vmem:[#allocation8 + $0x90] sm:$0xff] }
  0x7d   : > { %663 = vmatpush.msra.mxu0 %v610_v2  ;;  %683 = vmatpush.msra.mxu1 %v626_v3  ;;  %v421_v2 = vld [vmem:[#allocation7] sm:$0xf] }
  0x7e   : > { %703 = vmatpush.msra.mxu2 %v642_v4  ;;  %723 = vmatpush.msra.mxu3 %v658_v5  ;;  %v423_v3 = vperm.slane %v421_v2, 0 }
  0x7f   : > { %664 = vmatpush.msra.mxu0 %v609_v6  ;;  %684 = vmatpush.msra.mxu1 %v625_v7  ;;  %v424_v7 = vperm.slane %v421_v2, 1 }
  0x80   : > { %704 = vmatpush.msra.mxu2 %v641_v8  ;;  %724 = vmatpush.msra.mxu3 %v657_v9 }
  0x81   : > { %665 = vmatpush.msra.mxu0 %v608_v10  ;;  %685 = vmatpush.msra.mxu1 %v624_v11 }
  0x82   : > { %705 = vmatpush.msra.mxu2 %v640_v12  ;;  %725 = vmatpush.msra.mxu3 %v656_v13  ;;  %v425_v12 = vperm.slane %v421_v2, 2 }
  0x83   : > { %666 = vmatpush.msra.mxu0 %v607_v14  ;;  %686 = vmatpush.msra.mxu1 %v623_v15 }
  0x84   : > { %706 = vmatpush.msra.mxu2 %v639_v16  ;;  %726 = vmatpush.msra.mxu3 %v655_v17 }
  0x85   : > { %667 = vmatpush.msra.mxu0 %v606_v18  ;;  %687 = vmatpush.msra.mxu1 %v622_v19 }
  0x86   : > { %707 = vmatpush.msra.mxu2 %v638_v20  ;;  %727 = vmatpush.msra.mxu3 %v654_v21  ;;  %v426_v20 = vperm.slane %v421_v2, 3 }
  0x87   : > { %668 = vmatpush.msra.mxu0 %v605_v22  ;;  %688 = vmatpush.msra.mxu1 %v621_v23 }
  0x88   : > { %708 = vmatpush.msra.mxu2 %v637_v24  ;;  %728 = vmatpush.msra.mxu3 %v653_v37 }
  0x89   : > { %669 = vmatpush.msra.mxu0 %v604_v25  ;;  %689 = vmatpush.msra.mxu1 %v620_v26 }
  0x8a   : > { %709 = vmatpush.msra.mxu2 %v636_v27  ;;  %729 = vmatpush.msra.mxu3 %v652_v41  ;;  %v960_v27 = vld [vmem:[%s1362_s4] ss:$0 sm:$0xff] }
  0x8b   : > { %670 = vmatpush.msra.mxu0 %v603_v28  ;;  %690 = vmatpush.msra.mxu1 %v619_v29 }
  0x8c   : > { %710 = vmatpush.msra.mxu2 %v635_v30  ;;  %730 = vmatpush.msra.mxu3 %v651_v45 }
  0x8d   : > { %671 = vmatpush.msra.mxu0 %v602_v31  ;;  %691 = vmatpush.msra.mxu1 %v618_v32 }
  0x8e   : > { %711 = vmatpush.msra.mxu2 %v634_v36  ;;  %731 = vmatpush.msra.mxu3 %v650_v49 }
  0x8f   : > { %672 = vmatpush.msra.mxu0 %v601_v33  ;;  %692 = vmatpush.msra.mxu1 %v617_v35 }
  0x90   : > { %712 = vmatpush.msra.mxu2 %v633_v40  ;;  %732 = vmatpush.msra.mxu3 %v649_v53 }
  0x91   : > { %673 = vmatpush.msra.mxu0 %v600_v34  ;;  %693 = vmatpush.msra.mxu1 %v616_v39 }
  0x92   : > { %713 = vmatpush.msra.mxu2 %v632_v44  ;;  %733 = vmatpush.msra.mxu3 %v648_v57 }
  0x93   : > { %674 = vmatpush.msra.mxu0 %v599_v38  ;;  %694 = vmatpush.msra.mxu1 %v615_v43 }
  0x94   : > { %714 = vmatpush.msra.mxu2 %v631_v48  ;;  %734 = vmatpush.msra.mxu3 %v647_v60 }
  0x95   : > { %675 = vmatpush.msra.mxu0 %v598_v42  ;;  %695 = vmatpush.msra.mxu1 %v614_v47 }
  0x96   : > { %715 = vmatpush.msra.mxu2 %v630_v52  ;;  %735 = vmatpush.msra.mxu3 %v646_v62 }
  0x97   : > { %676 = vmatpush.msra.mxu0 %v597_v46  ;;  %696 = vmatpush.msra.mxu1 %v613_v51 }
  0x98   : > { %716 = vmatpush.msra.mxu2 %v629_v56  ;;  %736 = vmatpush.msra.mxu3 %v645_v63 }
  0x99   : > { %677 = vmatpush.msra.mxu0 %v596_v50  ;;  %697 = vmatpush.msra.mxu1 %v612_v55 }
  0x9a   : > { %717 = vmatpush.msra.mxu2 %v628_v59  ;;  %737 = vmatpush.msra.mxu3 %v644_v0 }
  0x9b   : > { %678 = vmatpush.msra.mxu0 %v595_v54  ;;  %698 = vmatpush.msra.mxu1 %v611_v58 }
  0x9c   : > { %718 = vmatpush.msra.mxu2 %v627_v61  ;;  %738 = vmatpush.msra.mxu3 %v643_v1 }
  0xed   : > { %v448_v4 = vpop.f32.mrf.mxu0 }
  0xee   : > { %v449_v5 = vadd.f32 %v448_v4, %v423_v3 }
  0xf0   : > { %v468_v6 = vpop.f32.mrf.mxu1 }
  0xf1   : > { %v469_v8 = vadd.f32 %v468_v6, %v449_v5 }
  0xf3   : > { %v591_v9 = vmax.f32 %v469_v8, 0.0  ;;  %v488_v10 = vpop.f32.mrf.mxu2 }
  0xf4   : > { %v489_v11 = vadd.f32 %v488_v10, %v424_v7 }
  0xf5   : > { %679 = vmatmul.f32.vlgmr.msra.gmra.mxu0 %v591_v9 }
  0xf6   : > { %v508_v13 = vpop.f32.mrf.mxu3 }
  0xf7   : > { %v509_v14 = vadd.f32 %v508_v13, %v489_v11  ;;  %v528_v15 = vpop.f32.mrf.mxu0 }
  0xf8   : > { %v529_v16 = vadd.f32 %v528_v15, %v425_v12 }
  0xf9   : > { %v592_v17 = vmax.f32 %v509_v14, 0.0  ;;  %v548_v18 = vpop.f32.mrf.mxu1 }
  0xfa   : > { %v549_v19 = vadd.f32 %v548_v18, %v529_v16 }
  0xfb   : > { %699 = vmatmul.f32.vlgmr.msra.gmra.mxu1 %v592_v17 }
  0xfc   : > { %v593_v21 = vmax.f32 %v549_v19, 0.0 }
  0xfd   : > { %v568_v22 = vpop.f32.mrf.mxu2 }
  0xfe   : > { %v569_v23 = vadd.f32 %v568_v22, %v426_v20  ;;  %719 = vmatmul.f32.vlgmr.msra.gmra.mxu2 %v593_v21 }
  0xff   : > { %v588_v24 = vpop.f32.mrf.mxu3 }
 0x100   : > { %v589_v25 = vadd.f32 %v588_v24, %v569_v23 }
 0x102   : > { %v594_v26 = vmax.f32 %v589_v25, 0.0 }
 0x104   : > { %739 = vmatmul.f32.vlgmr.msra.gmra.mxu3 %v594_v26 }
 0x172   : > { %v680_v28 = vpop.f32.mrf.mxu0 }
 0x173   : > { %v681_v29 = vadd.f32 %v960_v27, %v680_v28 }
 0x178   : > { %v700_v30 = vpop.f32.mrf.mxu1 }
 0x179   : > { %v701_v32 = vadd.f32 %v700_v30, %v681_v29 }
 0x181   : > { %v720_v31 = vpop.f32.mrf.mxu2 }
 0x182   : > { %v721_v33 = vadd.f32 %v720_v31, %v701_v32 }
 0x187   : > { %v740_v34 = vpop.f32.mrf.mxu3 }
 0x188   : > { %v741_v35 = vadd.f32 %v740_v34, %v721_v33 }
 0x18a   : > { %743 = vst [vmem:[%s290_s27] sm:$0xff] %v741_v35 }
 0x18b   : > { %1108 = shalt.err (!%p1105_p9)
}
 0x18c   : > { %893 = dma.vmem_to_hbm [thread:$0]  (%p1270_p13), %s758_s10, 128, %s760_s9, %s745_s11  }
 0x18d PF: > { %s771_s7 = sand.u32 1, %s1143_s18   ;;  %p1370_p10 = scmp.ge.s32.totalorder %s1155_s21, 2 }
 0x18e   : > { %s772_s14 = scalar_lea.sflag [#allocation4], %s771_s7 }
 0x18f   : > { %p910_p11 = pnand %p1370_p10, %p1275_p4 }
 0x191   : > { %p911_p0 = pneg %p910_p11 }
 0x193   : > { %1138 = dma.done.wait (%p911_p0), %s772_s14, 128  }
 0x194   : > { %1140 = vsyncadd (%p911_p0), %s772_s14, 4294967168  ;;  %p20_p2 = scmp.ge.s32.totalorder %s1250_s24, 4   ;;  %s1371_s18 = smov %s1147_s19 }
 0x195   : > { %s1372_s19 = smov %s1151_s20  ;;  %s1373_s20 = smov %s1262_s29 }
 0x196   : > { %s1374_s21 = smov %s1250_s24  ;;  %22 = sbr.rel (!%p20_p2) target bundleno = 7 (0x7), region = 97 }
 0x19b   :  { %778 = vsyncpa [#allocation3], 1 }
 0x19c   :  { %780 = vsyncpa [#allocation3 + $0x1], 1 }
 0x19d   :  { %781 = vsyncpa [#allocation6], 1 }
 0x19e   :  { %782 = vsyncpa [#allocation9], 1 }
 0x19f   :  { %783 = vsyncpa [#allocation4], 1 }
 0x1a0   :  { %785 = vsyncpa [#allocation4 + $0x1], 1 }

</bundles_post_ra>
